<compile_context>
chip_gen: v5e
topology: v5e:2x2
jax: 0.10.0
libtpu: 0.0.40
codegen_flags: <defaults>
</compile_context>

<pallas_src>
import math
import numpy as np
import jax
import jax.numpy as jnp
from jax.experimental import pallas as pl
from jax.experimental.pallas import tpu as pltpu


# ------------------------------- helpers ----------------------------------- #

def _pick_block_b(B):
    """Batches per grid step: block up to 8, keep >= 2 grid steps when possible
    (v7x has two TensorCores sharing the 'parallel' grid axis), divide B evenly."""
    if B <= 1:
        return 1
    bt = min(8, max(1, B // 2))
    while B % bt:
        bt -= 1
    return bt


# ------------------------------ Pallas kernel ------------------------------ #

def transformer_attn_pallas(x_sorted, g_flat, offs, *, C, PP):
    """x_sorted: [B, N, D] f32, parity-sorted along N (even patches first).
    g_flat: (C*C,) f32 row-major G = Wq^T @ Wk.  offs: (3,) = (off1, off2, off3).
    Returns (out_sorted [B, N, D], m [B, 2, half, half])."""
    B, N, D = x_sorted.shape
    half = N // 2
    Bt = _pick_block_b(B)
    grid = (B // Bt,)

    def kernel(off_ref, g_ref, x_ref, out_ref, m_ref):
        f32 = jnp.float32
        off1 = off_ref[0]          # diagonal offset        (self.offset)
        off2 = off_ref[1]          # pre-activation offset  (self.offset2)
        off3 = off_ref[2]          # post-activation offset (self.offset3)

        x = x_ref[...]                                          # [Bt, N, D]

        # Checkerboard keep-mask in parity-sorted patch order: sorted rows
        # [0, half) carry even original patch index, [half, N) odd, so
        # keep[i, d] == ((row_parity(i) + d) % 2 == 0).  Built once as [N, D].
        d_idx = jax.lax.broadcasted_iota(jnp.int32, (N, D), 1)
        r_idx = jax.lax.broadcasted_iota(jnp.int32, (N, D), 0)
        row_par = (r_idx >= half).astype(jnp.int32)
        keep = ((d_idx + row_par) & 1) == 0                     # [N, D]
        xm = jnp.where(keep[None], x, f32(0.0))                 # full_inp * mask

        # Channel mix with G = Wq^T @ Wk folded in the wrapper (one side only):
        # mixed[..., e*PP + s] = sum_c G[c, e] * xm[..., c*PP + s]
        slabs = [xm[:, :, c * PP:(c + 1) * PP] for c in range(C)]
        mixed_slabs = []
        for e in range(C):
            acc = g_ref[0 * C + e] * slabs[0]
            for c in range(1, C):
                acc = acc + g_ref[c * C + e] * slabs[c]
            mixed_slabs.append(acc)
        mixed = jnp.concatenate(mixed_slabs, axis=-1)           # [Bt, N, D]

        # Attention logits.  The attn checkerboard zeroes all cross-parity
        # entries, so only the even/even and odd/odd blocks are needed.
        # Single dot_general per block, contracting the full D = C*PP axis.
        le = jnp.einsum('bid,bjd->bij', mixed[:, :half], xm[:, :half],
                        preferred_element_type=f32)             # [Bt, half, half]
        lo = jnp.einsum('bid,bjd->bij', mixed[:, half:], xm[:, half:],
                        preferred_element_type=f32)

        def act(l):  # LeakyReLU(1e-4)(l + off2) + off3
            l = l + off2
            l = jnp.where(l >= 0, l, f32(0.0001) * l)
            return l + off3

        rr = jax.lax.broadcasted_iota(jnp.int32, (half, half), 0)
        cc = jax.lax.broadcasted_iota(jnp.int32, (half, half), 1)
        eye = (rr == cc).astype(f32)[None]                      # [1, half, half]
        # Reference adds offset*I to m1/m2 AND writes them back into attn
        # before out = attn @ v, so the same blocks are reused below.
        m1 = act(le) + off1 * eye                               # attn even/even
        m2 = act(lo) + off1 * eye                               # attn odd/odd
        m_ref[:, 0, :, :] = m1
        m_ref[:, 1, :, :] = m2

        # out = attn @ (full_inp * (1 - mask));  final = mask*x + (1-mask)*out
        v = x - xm                                              # deferred
        out_e = jnp.einsum('bij,bjd->bid', m1, v[:, :half],
                           preferred_element_type=f32)
        out_o = jnp.einsum('bij,bjd->bid', m2, v[:, half:],
                           preferred_element_type=f32)
        out = jnp.concatenate([out_e, out_o], axis=1)           # [Bt, N, D]
        out_ref[...] = jnp.where(keep[None], x, out)            # one dense store

    cost = pl.CostEstimate(
        flops=int(B * (2 * C * N * D + 2 * N * N * D)),
        transcendentals=0,
        bytes_accessed=int(4 * B * (2 * N * D + 2 * half * half)),
    )

    out, m = pl.pallas_call(
        kernel,
        out_shape=(
            jax.ShapeDtypeStruct((B, N, D), jnp.float32),
            jax.ShapeDtypeStruct((B, 2, half, half), jnp.float32),
        ),
        grid=grid,
        in_specs=[
            pl.BlockSpec(memory_space=pltpu.MemorySpace.SMEM),       # offsets (3,)
            pl.BlockSpec(memory_space=pltpu.MemorySpace.SMEM),       # G flat (C*C,)
            pl.BlockSpec((Bt, N, D), lambda b: (b, 0, 0)),           # x (sorted)
        ],
        out_specs=(
            pl.BlockSpec((Bt, N, D), lambda b: (b, 0, 0)),
            pl.BlockSpec((Bt, 2, half, half), lambda b: (b, 0, 0, 0)),
        ),
        compiler_params=pltpu.CompilerParams(
            dimension_semantics=("parallel",)),                      # v7x: 2 TCs
        cost_estimate=cost,
    )(offs, g_flat, x_sorted)
    return out, m


# --------------------------- module-level forward --------------------------- #

def transformer_attn_forward(z, params, logdet=0.0):
    """z: [B, C, H, W] float32 (NCHW, same as the PyTorch module, reverse=False)."""
    B, C, H, W = z.shape
    p = W // 2
    PP = p * p
    nh, nw = H // p, W // p
    N = nh * nw
    D = C * PP
    half = N // 2

    # patchify:  b c (h p1)(w p2) -> b (h w)(c p1 p2)
    # TODO(synk): this patchify transpose (and the inverse below) is an XLA copy
    #             pass around the kernel; folding it into the kernel is possible
    #             (in-kernel regroup rides the idle XLU slot) but not done here.
    x = z.astype(jnp.float32).reshape(B, C, nh, p, nw, p)
    x = x.transpose(0, 2, 4, 1, 3, 5).reshape(B, N, D)

    # parity-sort the patch axis (even patch indices first) so attn is
    # block-diagonal in the kernel; undone on the output below.
    perm = np.concatenate([np.arange(0, N, 2), np.arange(1, N, 2)])
    inv_perm = np.argsort(perm)
    x_sorted = jnp.take(x, perm, axis=1)

    wq = params["convq"].reshape(C, C).astype(jnp.float32)
    wk = params["convk"].reshape(C, C).astype(jnp.float32)
    g = wq.T @ wk                                   # logits = Xm (G ⊗ I_PP) Xm^T
    offs = jnp.concatenate(
        [params["offset"], params["offset2"], params["offset3"]]).astype(jnp.float32)

    out_sorted, m = transformer_attn_pallas(x_sorted, g.reshape(-1), offs, C=C, PP=PP)

    # log-determinant terms (m1/m2 already include offset * I, as in the reference)
    # TODO(synk): slogdet has no Pallas equivalent; computed with XLA on the
    #             kernel's dense m1/m2 outputs (sign discarded, like the reference).
    _, la1 = jnp.linalg.slogdet(m[:, 0])
    _, la2 = jnp.linalg.slogdet(m[:, 1])
    logdet = logdet + (la1 + la2) * float(p * (p // 2) * C)    # [B]

    # undo parity sort, then un-patchify back to NCHW
    out = jnp.take(out_sorted, inv_perm, axis=1)
    z_out = out.reshape(B, nh, nw, C, p, p).transpose(0, 3, 1, 4, 2, 5)
    z_out = z_out.reshape(B, C, H, W)
    return z_out, logdet


# --------------------------------- main ------------------------------------ #

if __name__ == "__main__":
    key = jax.random.PRNGKey(0)
    k_in, k_q, k_k = jax.random.split(key, 3)

    B, C, H, W = 2, 4, 16, 16                    # small, even-spatial test shape
    z = jax.random.normal(k_in, (B, C, H, W), dtype=jnp.float32)

    # deterministic parameter init (kaiming_uniform_ with a=sqrt(5) on [C,C,1,1]
    # has fan_in = C, bound = 1/sqrt(C)); F.conv2d is called without bias.
    bound = 1.0 / math.sqrt(C)
    params = {
        "convq": jax.random.uniform(k_q, (C, C, 1, 1), jnp.float32, -bound, bound),
        "convk": jax.random.uniform(k_k, (C, C, 1, 1), jnp.float32, -bound, bound),
        "offset": jnp.array([0.99], dtype=jnp.float32),
        "offset2": jnp.array([8.0], dtype=jnp.float32),
        "offset3": jnp.array([0.001], dtype=jnp.float32),
    }

    out, logdet = jax.jit(transformer_attn_forward)(z, params)
    jax.block_until_ready(out)
    jax.block_until_ready(logdet)
    print("KERNEL_OK")
</pallas_src>

<mosaic_0001>
module attributes {stable_mosaic.version = 11 : i64} {
  func.func @kernel(%arg0: i32, %arg1: memref<3xf32, #tpu.memory_space<smem>>, %arg2: memref<16xf32, #tpu.memory_space<smem>>, %arg3: memref<1x4x256xf32, #tpu.memory_space<vmem>>, %arg4: memref<1x4x256xf32, #tpu.memory_space<vmem>>, %arg5: memref<1x2x2x2xf32, #tpu.memory_space<vmem>>) attributes {dimension_semantics = [#tpu.dimension_semantics<parallel>], iteration_bounds = array<i64: 2>, scalar_prefetch = 0 : i64, scratch_operands = 0 : i64, tpu.core_type = #tpu.core_type<tc>, window_params = [{transform_indices = @transform_0, window_bounds = array<i64: 3>}, {transform_indices = @transform_1, window_bounds = array<i64: 16>}, {transform_indices = @transform_2, window_bounds = array<i64: 1, 4, 256>}, {transform_indices = @transform_3, window_bounds = array<i64: 1, 4, 256>}, {transform_indices = @transform_4, window_bounds = array<i64: 1, 2, 2, 2>}]} {
    %c0 = arith.constant 0 : index
    %0 = memref.load %arg1[%c0] : memref<3xf32, #tpu.memory_space<smem>>
    %c1 = arith.constant 1 : index
    %1 = memref.load %arg1[%c1] : memref<3xf32, #tpu.memory_space<smem>>
    %c2 = arith.constant 2 : index
    %2 = memref.load %arg1[%c2] : memref<3xf32, #tpu.memory_space<smem>>
    %c0_0 = arith.constant 0 : index
    %c0_1 = arith.constant 0 : index
    %c0_2 = arith.constant 0 : index
    %3 = vector.load %arg3[%c0_0, %c0_1, %c0_2] : memref<1x4x256xf32, #tpu.memory_space<vmem>>, vector<1x4x256xf32>
    %4 = tpu.iota {dimensions = array<i32: 1>} : vector<4x256xi32>
    %5 = tpu.iota {dimensions = array<i32: 0>} : vector<4x256xi32>
    %c2_i32 = arith.constant 2 : i32
    %6 = vector.broadcast %c2_i32 : i32 to vector<4x256xi32>
    %7 = arith.cmpi sge, %5, %6 : vector<4x256xi32>
    %8 = arith.extui %7 : vector<4x256xi1> to vector<4x256xi32>
    %9 = arith.addi %4, %8 : vector<4x256xi32>
    %c1_i32 = arith.constant 1 : i32
    %10 = vector.broadcast %c1_i32 : i32 to vector<4x256xi32>
    %11 = arith.andi %9, %10 : vector<4x256xi32>
    %c0_i32 = arith.constant 0 : i32
    %12 = vector.broadcast %c0_i32 : i32 to vector<4x256xi32>
    %13 = arith.cmpi eq, %11, %12 : vector<4x256xi32>
    %14 = vector.shape_cast %13 : vector<4x256xi1> to vector<1x4x256xi1>
    %cst = arith.constant 0.000000e+00 : f32
    %15 = vector.broadcast %cst : f32 to vector<1x4x256xf32>
    %16 = arith.select %14, %3, %15 : vector<1x4x256xi1>, vector<1x4x256xf32>
    %17 = vector.extract_strided_slice %16 {offsets = [0, 0, 0], sizes = [1, 4, 64], strides = [1, 1, 1]} : vector<1x4x256xf32> to vector<1x4x64xf32>
    %18 = vector.extract_strided_slice %16 {offsets = [0, 0, 64], sizes = [1, 4, 64], strides = [1, 1, 1]} : vector<1x4x256xf32> to vector<1x4x64xf32>
    %19 = vector.extract_strided_slice %16 {offsets = [0, 0, 128], sizes = [1, 4, 64], strides = [1, 1, 1]} : vector<1x4x256xf32> to vector<1x4x64xf32>
    %20 = vector.extract_strided_slice %16 {offsets = [0, 0, 192], sizes = [1, 4, 64], strides = [1, 1, 1]} : vector<1x4x256xf32> to vector<1x4x64xf32>
    %c0_3 = arith.constant 0 : index
    %21 = memref.load %arg2[%c0_3] : memref<16xf32, #tpu.memory_space<smem>>
    %22 = vector.broadcast %21 : f32 to vector<1x4x64xf32>
    %23 = arith.mulf %22, %17 : vector<1x4x64xf32>
    %c4 = arith.constant 4 : index
    %24 = memref.load %arg2[%c4] : memref<16xf32, #tpu.memory_space<smem>>
    %25 = vector.broadcast %24 : f32 to vector<1x4x64xf32>
    %26 = arith.mulf %25, %18 : vector<1x4x64xf32>
    %27 = arith.addf %23, %26 : vector<1x4x64xf32>
    %c8 = arith.constant 8 : index
    %28 = memref.load %arg2[%c8] : memref<16xf32, #tpu.memory_space<smem>>
    %29 = vector.broadcast %28 : f32 to vector<1x4x64xf32>
    %30 = arith.mulf %29, %19 : vector<1x4x64xf32>
    %31 = arith.addf %27, %30 : vector<1x4x64xf32>
    %c12 = arith.constant 12 : index
    %32 = memref.load %arg2[%c12] : memref<16xf32, #tpu.memory_space<smem>>
    %33 = vector.broadcast %32 : f32 to vector<1x4x64xf32>
    %34 = arith.mulf %33, %20 : vector<1x4x64xf32>
    %35 = arith.addf %31, %34 : vector<1x4x64xf32>
    %c1_4 = arith.constant 1 : index
    %36 = memref.load %arg2[%c1_4] : memref<16xf32, #tpu.memory_space<smem>>
    %37 = vector.broadcast %36 : f32 to vector<1x4x64xf32>
    %38 = arith.mulf %37, %17 : vector<1x4x64xf32>
    %c5 = arith.constant 5 : index
    %39 = memref.load %arg2[%c5] : memref<16xf32, #tpu.memory_space<smem>>
    %40 = vector.broadcast %39 : f32 to vector<1x4x64xf32>
    %41 = arith.mulf %40, %18 : vector<1x4x64xf32>
    %42 = arith.addf %38, %41 : vector<1x4x64xf32>
    %c9 = arith.constant 9 : index
    %43 = memref.load %arg2[%c9] : memref<16xf32, #tpu.memory_space<smem>>
    %44 = vector.broadcast %43 : f32 to vector<1x4x64xf32>
    %45 = arith.mulf %44, %19 : vector<1x4x64xf32>
    %46 = arith.addf %42, %45 : vector<1x4x64xf32>
    %c13 = arith.constant 13 : index
    %47 = memref.load %arg2[%c13] : memref<16xf32, #tpu.memory_space<smem>>
    %48 = vector.broadcast %47 : f32 to vector<1x4x64xf32>
    %49 = arith.mulf %48, %20 : vector<1x4x64xf32>
    %50 = arith.addf %46, %49 : vector<1x4x64xf32>
    %c2_5 = arith.constant 2 : index
    %51 = memref.load %arg2[%c2_5] : memref<16xf32, #tpu.memory_space<smem>>
    %52 = vector.broadcast %51 : f32 to vector<1x4x64xf32>
    %53 = arith.mulf %52, %17 : vector<1x4x64xf32>
    %c6 = arith.constant 6 : index
    %54 = memref.load %arg2[%c6] : memref<16xf32, #tpu.memory_space<smem>>
    %55 = vector.broadcast %54 : f32 to vector<1x4x64xf32>
    %56 = arith.mulf %55, %18 : vector<1x4x64xf32>
    %57 = arith.addf %53, %56 : vector<1x4x64xf32>
    %c10 = arith.constant 10 : index
    %58 = memref.load %arg2[%c10] : memref<16xf32, #tpu.memory_space<smem>>
    %59 = vector.broadcast %58 : f32 to vector<1x4x64xf32>
    %60 = arith.mulf %59, %19 : vector<1x4x64xf32>
    %61 = arith.addf %57, %60 : vector<1x4x64xf32>
    %c14 = arith.constant 14 : index
    %62 = memref.load %arg2[%c14] : memref<16xf32, #tpu.memory_space<smem>>
    %63 = vector.broadcast %62 : f32 to vector<1x4x64xf32>
    %64 = arith.mulf %63, %20 : vector<1x4x64xf32>
    %65 = arith.addf %61, %64 : vector<1x4x64xf32>
    %c3 = arith.constant 3 : index
    %66 = memref.load %arg2[%c3] : memref<16xf32, #tpu.memory_space<smem>>
    %67 = vector.broadcast %66 : f32 to vector<1x4x64xf32>
    %68 = arith.mulf %67, %17 : vector<1x4x64xf32>
    %c7 = arith.constant 7 : index
    %69 = memref.load %arg2[%c7] : memref<16xf32, #tpu.memory_space<smem>>
    %70 = vector.broadcast %69 : f32 to vector<1x4x64xf32>
    %71 = arith.mulf %70, %18 : vector<1x4x64xf32>
    %72 = arith.addf %68, %71 : vector<1x4x64xf32>
    %c11 = arith.constant 11 : index
    %73 = memref.load %arg2[%c11] : memref<16xf32, #tpu.memory_space<smem>>
    %74 = vector.broadcast %73 : f32 to vector<1x4x64xf32>
    %75 = arith.mulf %74, %19 : vector<1x4x64xf32>
    %76 = arith.addf %72, %75 : vector<1x4x64xf32>
    %c15 = arith.constant 15 : index
    %77 = memref.load %arg2[%c15] : memref<16xf32, #tpu.memory_space<smem>>
    %78 = vector.broadcast %77 : f32 to vector<1x4x64xf32>
    %79 = arith.mulf %78, %20 : vector<1x4x64xf32>
    %80 = arith.addf %76, %79 : vector<1x4x64xf32>
    %81 = tpu.concatenate %35, %50, %65, %80 in 2 : vector<1x4x64xf32>, vector<1x4x64xf32>, vector<1x4x64xf32>, vector<1x4x64xf32> -> vector<1x4x256xf32>
    %82 = vector.extract_strided_slice %81 {offsets = [0, 0, 0], sizes = [1, 2, 256], strides = [1, 1, 1]} : vector<1x4x256xf32> to vector<1x2x256xf32>
    %83 = vector.extract_strided_slice %16 {offsets = [0, 0, 0], sizes = [1, 2, 256], strides = [1, 1, 1]} : vector<1x4x256xf32> to vector<1x2x256xf32>
    "tpu.trace_start"() <{level = 10 : i32, message = "bid,bjd->bij"}> : () -> ()
    %cst_6 = arith.constant dense<0.000000e+00> : vector<1x2x2xf32>
    %84 = tpu.matmul %82, %83, %cst_6 {dimension_numbers = #tpu.dot_dimension_numbers<[2], [2], [1], [1], [0, 0, 0, 1, 1, 1], [0], [0]>} : vector<1x2x256xf32>, vector<1x2x256xf32>, vector<1x2x2xf32> -> vector<1x2x2xf32>
    "tpu.trace_stop"() : () -> ()
    %85 = vector.extract_strided_slice %81 {offsets = [0, 2, 0], sizes = [1, 2, 256], strides = [1, 1, 1]} : vector<1x4x256xf32> to vector<1x2x256xf32>
    %86 = vector.extract_strided_slice %16 {offsets = [0, 2, 0], sizes = [1, 2, 256], strides = [1, 1, 1]} : vector<1x4x256xf32> to vector<1x2x256xf32>
    "tpu.trace_start"() <{level = 10 : i32, message = "bid,bjd->bij"}> : () -> ()
    %cst_7 = arith.constant dense<0.000000e+00> : vector<1x2x2xf32>
    %87 = tpu.matmul %85, %86, %cst_7 {dimension_numbers = #tpu.dot_dimension_numbers<[2], [2], [1], [1], [0, 0, 0, 1, 1, 1], [0], [0]>} : vector<1x2x256xf32>, vector<1x2x256xf32>, vector<1x2x2xf32> -> vector<1x2x2xf32>
    "tpu.trace_stop"() : () -> ()
    %88 = tpu.iota {dimensions = array<i32: 0>} : vector<2x2xi32>
    %89 = tpu.iota {dimensions = array<i32: 1>} : vector<2x2xi32>
    %90 = arith.cmpi eq, %88, %89 : vector<2x2xi32>
    %91 = arith.extui %90 : vector<2x2xi1> to vector<2x2xi32>
    %92 = arith.sitofp %91 : vector<2x2xi32> to vector<2x2xf32>
    %93 = vector.shape_cast %92 : vector<2x2xf32> to vector<1x2x2xf32>
    %94 = vector.broadcast %1 : f32 to vector<1x2x2xf32>
    %95 = arith.addf %84, %94 : vector<1x2x2xf32>
    %cst_8 = arith.constant 0.000000e+00 : f32
    %96 = vector.broadcast %cst_8 : f32 to vector<1x2x2xf32>
    %97 = arith.cmpf oge, %95, %96 : vector<1x2x2xf32>
    %cst_9 = arith.constant 9.99999974E-5 : f32
    %98 = vector.broadcast %cst_9 : f32 to vector<1x2x2xf32>
    %99 = arith.mulf %98, %95 : vector<1x2x2xf32>
    %100 = arith.select %97, %95, %99 : vector<1x2x2xi1>, vector<1x2x2xf32>
    %101 = vector.broadcast %2 : f32 to vector<1x2x2xf32>
    %102 = arith.addf %100, %101 : vector<1x2x2xf32>
    %103 = vector.broadcast %0 : f32 to vector<1x2x2xf32>
    %104 = arith.mulf %103, %93 : vector<1x2x2xf32>
    %105 = arith.addf %102, %104 : vector<1x2x2xf32>
    %106 = vector.broadcast %1 : f32 to vector<1x2x2xf32>
    %107 = arith.addf %87, %106 : vector<1x2x2xf32>
    %cst_10 = arith.constant 0.000000e+00 : f32
    %108 = vector.broadcast %cst_10 : f32 to vector<1x2x2xf32>
    %109 = arith.cmpf oge, %107, %108 : vector<1x2x2xf32>
    %cst_11 = arith.constant 9.99999974E-5 : f32
    %110 = vector.broadcast %cst_11 : f32 to vector<1x2x2xf32>
    %111 = arith.mulf %110, %107 : vector<1x2x2xf32>
    %112 = arith.select %109, %107, %111 : vector<1x2x2xi1>, vector<1x2x2xf32>
    %113 = vector.broadcast %2 : f32 to vector<1x2x2xf32>
    %114 = arith.addf %112, %113 : vector<1x2x2xf32>
    %115 = vector.broadcast %0 : f32 to vector<1x2x2xf32>
    %116 = arith.mulf %115, %93 : vector<1x2x2xf32>
    %117 = arith.addf %114, %116 : vector<1x2x2xf32>
    %c0_12 = arith.constant 0 : index
    %c0_13 = arith.constant 0 : index
    %c0_14 = arith.constant 0 : index
    %c0_15 = arith.constant 0 : index
    %118 = vector.load %arg5[%c0_12, %c0_13, %c0_14, %c0_15] : memref<1x2x2x2xf32, #tpu.memory_space<vmem>>, vector<1x1x2x2xf32>
    %119 = vector.shape_cast %118 : vector<1x1x2x2xf32> to vector<1x2x2xf32>
    %120 = vector.shape_cast %105 : vector<1x2x2xf32> to vector<1x1x2x2xf32>
    tpu.vector_store %arg5[%c0_12, %c0_13, %c0_14, %c0_15], %120 {strides = array<i32>} : memref<1x2x2x2xf32, #tpu.memory_space<vmem>>, vector<1x1x2x2xf32>,
    %c0_16 = arith.constant 0 : index
    %c1_17 = arith.constant 1 : index
    %c0_18 = arith.constant 0 : index
    %c0_19 = arith.constant 0 : index
    %121 = vector.load %arg5[%c0_16, %c1_17, %c0_18, %c0_19] : memref<1x2x2x2xf32, #tpu.memory_space<vmem>>, vector<1x1x2x2xf32>
    %122 = vector.shape_cast %121 : vector<1x1x2x2xf32> to vector<1x2x2xf32>
    %123 = vector.shape_cast %117 : vector<1x2x2xf32> to vector<1x1x2x2xf32>
    tpu.vector_store %arg5[%c0_16, %c1_17, %c0_18, %c0_19], %123 {strides = array<i32>} : memref<1x2x2x2xf32, #tpu.memory_space<vmem>>, vector<1x1x2x2xf32>,
    %124 = arith.subf %3, %16 : vector<1x4x256xf32>
    %125 = vector.extract_strided_slice %124 {offsets = [0, 0, 0], sizes = [1, 2, 256], strides = [1, 1, 1]} : vector<1x4x256xf32> to vector<1x2x256xf32>
    "tpu.trace_start"() <{level = 10 : i32, message = "bij,bjd->bid"}> : () -> ()
    %cst_20 = arith.constant dense<0.000000e+00> : vector<1x2x256xf32>
    %126 = tpu.matmul %105, %125, %cst_20 {dimension_numbers = #tpu.dot_dimension_numbers<[2], [1], [1], [2], [0, 0, 0, 1, 1, 2], [0], [0]>} : vector<1x2x2xf32>, vector<1x2x256xf32>, vector<1x2x256xf32> -> vector<1x2x256xf32>
    "tpu.trace_stop"() : () -> ()
    %127 = vector.extract_strided_slice %124 {offsets = [0, 2, 0], sizes = [1, 2, 256], strides = [1, 1, 1]} : vector<1x4x256xf32> to vector<1x2x256xf32>
    "tpu.trace_start"() <{level = 10 : i32, message = "bij,bjd->bid"}> : () -> ()
    %cst_21 = arith.constant dense<0.000000e+00> : vector<1x2x256xf32>
    %128 = tpu.matmul %117, %127, %cst_21 {dimension_numbers = #tpu.dot_dimension_numbers<[2], [1], [1], [2], [0, 0, 0, 1, 1, 2], [0], [0]>} : vector<1x2x2xf32>, vector<1x2x256xf32>, vector<1x2x256xf32> -> vector<1x2x256xf32>
    "tpu.trace_stop"() : () -> ()
    %129 = tpu.concatenate %126, %128 in 1 : vector<1x2x256xf32>, vector<1x2x256xf32> -> vector<1x4x256xf32>
    %130 = vector.shape_cast %13 : vector<4x256xi1> to vector<1x4x256xi1>
    %131 = arith.select %130, %3, %129 : vector<1x4x256xi1>, vector<1x4x256xf32>
    %c0_22 = arith.constant 0 : index
    %c0_23 = arith.constant 0 : index
    %c0_24 = arith.constant 0 : index
    %132 = vector.load %arg4[%c0_22, %c0_23, %c0_24] : memref<1x4x256xf32, #tpu.memory_space<vmem>>, vector<1x4x256xf32>
    tpu.vector_store %arg4[%c0_22, %c0_23, %c0_24], %131 {strides = array<i32>} : memref<1x4x256xf32, #tpu.memory_space<vmem>>, vector<1x4x256xf32>,
    return
  }
  func.func @transform_0(%arg0: i32) -> i32 {
    %c0_i32 = arith.constant 0 : i32
    %c0_i32_0 = arith.constant 0 : i32
    return %c0_i32 : i32
  }
  func.func @transform_1(%arg0: i32) -> i32 {
    %c0_i32 = arith.constant 0 : i32
    %c0_i32_0 = arith.constant 0 : i32
    return %c0_i32 : i32
  }
  func.func @transform_2(%arg0: i32) -> (i32, i32, i32) {
    %c0_i32 = arith.constant 0 : i32
    %c0_i32_0 = arith.constant 0 : i32
    %c0_i32_1 = arith.constant 0 : i32
    return %arg0, %c0_i32, %c0_i32_0 : i32, i32, i32
  }
  func.func @transform_3(%arg0: i32) -> (i32, i32, i32) {
    %c0_i32 = arith.constant 0 : i32
    %c0_i32_0 = arith.constant 0 : i32
    %c0_i32_1 = arith.constant 0 : i32
    return %arg0, %c0_i32, %c0_i32_0 : i32, i32, i32
  }
  func.func @transform_4(%arg0: i32) -> (i32, i32, i32, i32) {
    %c0_i32 = arith.constant 0 : i32
    %c0_i32_0 = arith.constant 0 : i32
    %c0_i32_1 = arith.constant 0 : i32
    %c0_i32_2 = arith.constant 0 : i32
    return %arg0, %c0_i32, %c0_i32_0, %c0_i32_1 : i32, i32, i32, i32
  }
}

</mosaic_0001>

<bundles_post_ra>
// kernel: transformer_attn_forward.1
= control target key start
LH: loop header
LB: loop body
LE: loop exit
PB: predicated region body
PF: predicated region fallthrough
CT: control target
= control target key end

     0   :  { %10 = vsyncpa [#allocation3], 0  ;;  %s999_s0 = inlined_call_operand.vmem [shape: f32[3], index: 0, kind: input, shape index: {}]   ;;  %s1000_s1 = inlined_call_operand.vmem [shape: f32[16], index: 1, kind: input, shape index: {}]   ;;  %s1001_s2 = inlined_call_operand.vmem [shape: f32[2,4,256], index: 2, kind: input, shape index: {}]   ;;  %s1002_s3 = inlined_call_operand.vmem [shape: f32[2,4,256], index: 3, kind: output, shape index: {0}]   ;;  %s1003_s4 = inlined_call_operand.vmem [shape: f32[2,2,2,2], index: 4, kind: output, shape index: {1}]  }
   0x1   :  { %11 = vsyncpa [#allocation5], 0  ;;  %s882_s15 = smov 0  }
   0x2 LB: > { %s720_s16 = sadd.s32 4294967295, %s850_s15   ;;  %p722_p0 = scmp.ge.s32.totalorder %s850_s15, 1  ;;  %s850_s15 = sphi %s882_s15, %s17_s15  }
   0x3   : > { %p142_p1 = scmp.lt.s32.totalorder %s850_s15, 3  ;;  %s154_s19 = sshll.u32 %s999_s0, 4  ;;  %s155_s19 = int_to_ptr.vmem [resolvable:$true] %s154_s19 }
   0x4   : > { %p784_p3 = scmp.eq.s32.totalorder %s720_s16, 0  ;;  %s164_s22 = sshll.u32 %s1000_s1, 4  ;;  %s165_s22 = int_to_ptr.vmem [resolvable:$true] %s164_s22 }
   0x5   : > { %p143_p2 = pnand %p722_p0, %p142_p1  ;;  %s852_s23 = smov [#allocation2]  }
   0x6   : > { %s853_s24 = smov [#allocation4]  }
   0x7   : > { %p777_p4 = pneg %p143_p2 }
   0x8   : > { %185 = sbr.rel (%p143_p2) target bundleno = 545 (0x221), region = 32 }
   0x9   : > { %p778_p5 = pnand %p784_p3, %p777_p4 }
   0xb   : > { %780 = dma.vmem_to_smem (!%p778_p5), %s155_s19, 16, %s852_s23, [#allocation3]  }
   0xc   : > { %783 = dma.vmem_to_smem (!%p778_p5), %s165_s22, 16, %s853_s24, [#allocation5]  }
   0xd   : > { %841 = dma.done.wait (%p784_p3), [#allocation3], 16  }
   0xe   : > { %843 = vsyncadd (%p784_p3), [#allocation3], 4294967280 }
   0xf   : > { %845 = dma.done.wait (%p784_p3), [#allocation5], 16  }
  0x10   : > { %847 = vsyncadd (%p784_p3), [#allocation5], 4294967280 }
  0x11   : > { %197 = sfence }
  0x12   : > { %p223_p6 = scmp.lt.s32.totalorder %s720_s16, 1  ;;  %v242_v0 = vlaneseq  ;;  %s741_s26 = sld [smem:[#allocation4 + $0x5]]  ;;  %v854_v4 = vmov 0   ;;  %vm363_vm3 = vcmask 523264   ;;  %vm480_vm4 = vcmask 1043456  }
  0x13   : > { %s743_s30 = sld [smem:[#allocation4 + $0xd]]  ;;  %s855_s7 = smov 64   ;;  %vm492_vm5 = vcmask 1041408   ;;  %vm475_vm8 = vcmask 9216   ;;  %vm488_vm9 = vcmask 15360  }
  0x14   : > { %s1009_s16 = smov (!%p223_p6, %s720_s16), 1  ;;  %v903_v1 = vand.u32 127, %v242_v0  ;;  %v905_v2 = vshrl.u32 %v242_v0, 7  ;;  %s749_s5 = sld [smem:[#allocation4 + $0x7]] }
  0x15   : > { %s766_s25 = sshll.u32 %s1009_s16, 3  ;;  %s751_s6 = sld [smem:[#allocation4 + $0xf]] }
  0x16   : > { %vm247_vm0 = vcmp.ge.s32.totalorder %v905_v2, 2  ;;  %v244_v3 = vadd.s32 128, %v903_v1  ;;  %s227_s29 = scalar_lea.vmem %s1001_s2, %s766_s25  ;;  %s739_s8 = sld [smem:[#allocation4 + $0xc]]  ;;  %vm366_vm6 = vcmp.eq.s32.totalorder %v905_v2, %v903_v1 }
  0x17   : > { %v248_v5 = vsel %vm247_vm0, 1, %v854_v4  ;;  %v915_v6 = vld [vmem:[%s227_s29] sm:$0xff]  ;;  %s747_s9 = sld [smem:[#allocation4 + $0xe]] }
  0x18   : > { %v249_v7 = vadd.s32 %v248_v5, %v903_v1  ;;  %v250_v8 = vadd.s32 %v248_v5, %v244_v3  ;;  %256 = vst [vmem:[#allocation1] ss:$2 sm:$0xff] %v915_v6  ;;  %v290_v13 = vstv %s741_s26  ;;  %s737_s10 = sld [smem:[#allocation4 + $0x4]]  ;;  %s768_s26 = sshll.u32 %s1009_s16, 2 }
  0x19   : > { %v302_v14 = vstv %s743_s30  ;;  %s745_s11 = sld [smem:[#allocation4 + $0x6]]  ;;  %s237_s29 = scalar_lea.vmem %s1003_s4, %s768_s26 }
  0x1a   : > { %v251_v9 = vand.u32 1, %v249_v7  ;;  %v252_v10 = vand.u32 1, %v250_v8  ;;  %v336_v21 = vstv %s749_s5  ;;  %s740_s12 = sld [smem:[#allocation4 + $0x1]] }
  0x1b   : > { %v348_v22 = vstv %s751_s6  ;;  %s742_s13 = sld [smem:[#allocation4 + $0x9]]  ;;  %s232_s6 = scalar_lea.vmem %s1002_s3, %s766_s25 }
  0x1c   : > { %vm919_vm1 = vcmp.eq.s32.totalorder %v251_v9, 0  ;;  %vm923_vm2 = vcmp.eq.s32.totalorder %v252_v10, 0  ;;  %v279_v25 = vstv %s739_s8  ;;  %s748_s14 = sld [smem:[#allocation4 + $0x3]] }
  0x1d   : > { %v325_v26 = vstv %s747_s9  ;;  %s750_s17 = sld [smem:[#allocation4 + $0xb]] }
  0x1e   : > { %v267_v29 = vstv %s737_s10  ;;  %s263_s18 = sld [smem:[#allocation4]] }
  0x1f   : > { %v257_v15 = vld.sshfl [vmem:[#allocation1] sm:$0xff pattern:$0x75316420]  ;;  %v258_v16 = vld.sshfl [vmem:[#allocation1 + $0x8] sm:$0xff pattern:$0x75316420]  ;;  %v313_v31 = vstv %s745_s11 }
  0x20   : > { %v929_v17 = vsel %vm919_vm1, %v257_v15, 0.0  ;;  %v933_v18 = vsel %vm923_vm2, %v258_v16, 0.0  ;;  %753 = vmatpush.xpose.msk.msra.mxu0 %vm919_vm1, %v257_v15  ;;  %754 = vmatpush.xpose.msk.msra.mxu1 %vm923_vm2, %v258_v16  ;;  %v287_v33 = vstv %s740_s12  ;;  %s744_s19 = sld [smem:[#allocation4 + $0x2]] }
  0x21   : > { %v291_v19 = vmul.f32 %v290_v13, %v929_v17  ;;  %v303_v20 = vmul.f32 %v302_v14, %v933_v18  ;;  %v337_v23 = vmul.f32 %v336_v21, %v929_v17  ;;  %v349_v24 = vmul.f32 %v348_v22, %v933_v18  ;;  %s738_s20 = sld [smem:[#allocation4 + $0x8]] }
  0x22   : > { %v280_v27 = vmul.f32 %v279_v25, %v933_v18  ;;  %v326_v28 = vmul.f32 %v325_v26, %v933_v18  ;;  %v268_v30 = vmul.f32 %v267_v29, %v929_v17  ;;  %v314_v32 = vmul.f32 %v313_v31, %v929_v17  ;;  %s746_s21 = sld [smem:[#allocation4 + $0xa]] }
  0x23   : > { %293 = vrot.lane.b32.xlu0 %v291_v19, %s855_s7  ;;  %305 = vrot.lane.b32.xlu1 %v303_v20, %s855_s7  ;;  %v288_v36 = vmul.f32 %v287_v33, %v929_v17  ;;  %v298_v37 = vstv %s742_s13  ;;  %v333_v38 = vstv %s748_s14  ;;  %v426_v52 = vrot.slane %v929_v17, 2  ;;  %s735_s22 = sld [smem:[#allocation2 + $0x1]] }
  0x24   : > { %270 = vrot.lane.b32.xlu2 %v268_v30, %s855_s7  ;;  %v344_v39 = vstv %s750_s17  ;;  %v299_v41 = vmul.f32 %v298_v37, %v933_v18  ;;  %v334_v42 = vmul.f32 %v333_v38, %v929_v17  ;;  %v427_v53 = vrot.slane %v933_v18, 2  ;;  %s238_s23 = sld [smem:[#allocation2]] }
  0x25   : > { %v345_v43 = vmul.f32 %v344_v39, %v933_v18  ;;  %445 = vmatpush.xpose.msra.mxu2 %v426_v52  ;;  %v264_v55 = vstv %s263_s18  ;;  %v479_v22 = vrot.slane %v933_v18, 4  ;;  %s975_s24 = sld [smem:[#allocation2 + $0x2]] }
  0x26   : > { %465 = vmatpush.xpose.msra.mxu3 %v427_v53  ;;  %v310_v56 = vstv %s744_s19  ;;  %v265_v57 = vmul.f32 %v264_v55, %v929_v17 }
  0x27   : > { %v311_v58 = vmul.f32 %v310_v56, %v929_v17  ;;  %v275_v59 = vstv %s738_s20 }
  0x28   : > { %v321_v61 = vstv %s746_s21  ;;  %v276_v63 = vmul.f32 %v275_v59, %v933_v18 }
  0x29   : > { %v322_v3 = vmul.f32 %v321_v61, %v933_v18 }
  0x2b   : > { %339 = vrot.lane.b32.xlu0 %v337_v23, %s855_s7  ;;  %351 = vrot.lane.b32.xlu1 %v349_v24, %s855_s7  ;;  %v481_v23 = vsel %vm480_vm4, %v929_v17, %v479_v22  ;;  %v369_v17 = vstv %s735_s22  ;;  %v413_v37 = vstv %s975_s24 }
  0x2c   : > { %316 = vrot.lane.b32.xlu2 %v314_v32, %s855_s7  ;;  %v483_v24 = vsub.f32 %v915_v6, %v481_v23 }
  0x2e   : > { %485 = vst [vmem:[#allocation1] ss:$2 sm:$0xff] %v483_v24 }
  0x33   : > { %282 = vrot.lane.b32.xlu0 %v280_v27, %s855_s7  ;;  %328 = vrot.lane.b32.xlu1 %v326_v28, %s855_s7 }
  0x35   : > { %v486_v25 = vld.sshfl [vmem:[#allocation1] sm:$0xff pattern:$0x75316420]  ;;  %v487_v26 = vld.sshfl [vmem:[#allocation1 + $0x8] sm:$0xff pattern:$0x75316420] }
  0x36   : > { %537 = vst [vmem:[#allocation1] ss:$2 sm:$0xff] %v483_v24  ;;  %756 = vmatpush.msk.msrb.mxu0 %vm492_vm5, %v486_v25  ;;  %758 = vmatpush.msk.msrb.mxu1 %vm492_vm5, %v487_v26 }
  0x3d   : > { %v539_v27 = vld.sshfl [vmem:[#allocation1 + $0x8] sm:$0xff pattern:$0x75316420]  ;;  %v538_v28 = vld.sshfl [vmem:[#allocation1] sm:$0xff pattern:$0x75316420] }
  0x3e   : > { %v541_v29 = vrot.slane %v539_v27, 2  ;;  %v540_v30 = vrot.slane %v538_v28, 2  ;;  %597 = vst [vmem:[#allocation1] ss:$2 sm:$0xff] %v915_v6 }
  0x40   : > { %762 = vmatpush.msk.msrb.mxu3 %vm492_vm5, %v541_v29  ;;  %760 = vmatpush.msk.msrb.mxu2 %vm492_vm5, %v540_v30 }
  0x45   : > { %v599_v52 = vld.sshfl [vmem:[#allocation1 + $0x8] sm:$0xff pattern:$0x75316420]  ;;  %v598_v56 = vld.sshfl [vmem:[#allocation1] sm:$0xff pattern:$0x75316420] }
  0x7e   : > { %v271_v54 = vpop.permute.xlu2 %270 }
  0x7f   : > { %v273_v62 = vadd.f32 %v271_v54, %v265_v57 }
  0x81   : > { %v277_v4 = vadd.f32 %v276_v63, %v273_v62 }
  0x86   : > { %v317_v60 = vpop.permute.xlu2 %316 }
  0x87   : > { %v319_v0 = vadd.f32 %v317_v60, %v311_v58 }
  0x89   : > { %v323_v5 = vadd.f32 %v322_v3, %v319_v0 }
  0x95   : > { %v294_v34 = vpop.permute.xlu0 %293  ;;  %v306_v35 = vpop.permute.xlu1 %305 }
  0x96   : > { %v296_v40 = vadd.f32 %v294_v34, %v288_v36  ;;  %v856_v34 = vmov 0.0  }
  0x97   : > { %v752_v6 = vsel %vm366_vm6, 1.0, %v856_v34 }
  0x98   : > { %v300_v45 = vadd.f32 %v299_v41, %v296_v40 }
  0x9a   : > { %v308_v49 = vadd.f32 %v306_v35, %v300_v45  ;;  %v415_v35 = vstv %s238_s23 }
  0x9b   : > { %v416_v38 = vmul.f32 %v752_v6, %v415_v35 }
  0x9d   : > { %v340_v44 = vpop.permute.xlu0 %339  ;;  %v352_v47 = vpop.permute.xlu1 %351 }
  0x9e   : > { %v342_v46 = vadd.f32 %v340_v44, %v334_v42 }
  0xa0   : > { %v346_v48 = vadd.f32 %v345_v43, %v342_v46 }
  0xa2   : > { %v354_v50 = vadd.f32 %v352_v47, %v346_v48 }
  0xa4   : > { %v801_v51 = vpack.i.bf16 %v354_v50, %v308_v49 }
  0xa5   : > { %v283_v7 = vpop.permute.xlu0 %282  ;;  %v329_v8 = vpop.permute.xlu1 %328 }
  0xa6   : > { %802 = vrot.lane.b32.xlu2 %v801_v51, %s855_s7  ;;  %v285_v10 = vadd.f32 %v283_v7, %v277_v4  ;;  %v331_v13 = vadd.f32 %v329_v8, %v323_v5 }
 0x100   : > { %v803_v9 = vpop.permute.xlu2 %802 }
 0x101   : > { %v805_v14 = vunpack.i.h.bf16 %v803_v9  ;;  %v804_v15 = vunpack.i.l.bf16 %v803_v9 }
 0x103   : > { %v364_v16 = vsel %vm363_vm3, %v285_v10, %v804_v15  ;;  %v365_v19 = vsel %vm363_vm3, %v331_v13, %v805_v14 }
 0x104   : > { %386 = vmatmul.f32.vlgmr.msra.gmra.mxu0 %v364_v16  ;;  %406 = vmatmul.f32.vlgmr.msra.gmra.mxu1 %v365_v19  ;;  %v420_v20 = vrot.slane %v364_v16, 2  ;;  %v421_v21 = vrot.slane %v365_v19, 2 }
 0x106   : > { %446 = vmatmul.f32.vlgmr.msra.gmra.mxu2 %v420_v20  ;;  %466 = vmatmul.f32.vlgmr.msra.gmra.mxu3 %v421_v21 }
 0x181   : > { %v387_v18 = vpop.f32.mrf.mxu0  ;;  %v407_v32 = vpop.f32.mrf.mxu1 }
 0x182   : > { %v388_v31 = vadd.f32 %v387_v18, %v369_v17 }
 0x184   : > { %v408_v33 = vadd.f32 %v407_v32, %v388_v31 }
 0x186   : > { %vm410_vm7 = vcmp.ge.f32.partialorder %v408_v33, 0.0  ;;  %v411_v36 = vmul.f32 0.0001, %v408_v33 }
 0x188   : > { %v412_v39 = vsel %vm410_vm7, %v408_v33, %v411_v36 }
 0x189   : > { %v414_v40 = vadd.f32 %v413_v37, %v412_v39  ;;  %v447_v41 = vpop.f32.mrf.mxu2  ;;  %v467_v1 = vpop.f32.mrf.mxu3 }
 0x18a   : > { %v448_v42 = vadd.f32 %v447_v41, %v369_v17 }
 0x18b   : > { %v417_v2 = vadd.f32 %v416_v38, %v414_v40 }
 0x18c   : > { %v468_v43 = vadd.f32 %v467_v1, %v448_v42 }
 0x18d   : > { %476 = vst.msk [vmem:[%s237_s29] sm:$0x3] %vm475_vm8, %v417_v2  ;;  %757 = vmatmul.msk.f32.vlgmr.msrb.gmra.mxu0 %vm488_vm9, %v417_v2  ;;  %759 = vmatmul.msk.f32.vlgmr.msrb.gmra.mxu1 %vm488_vm9, %v417_v2 }
 0x18e   : > { %vm470_vm10 = vcmp.ge.f32.partialorder %v468_v43, 0.0  ;;  %v471_v44 = vmul.f32 0.0001, %v468_v43 }
 0x190   : > { %v472_v45 = vsel %vm470_vm10, %v468_v43, %v471_v44 }
 0x191   : > { %v473_v46 = vadd.f32 %v472_v45, %v413_v37 }
 0x193   : > { %v474_v47 = vadd.f32 %v473_v46, %v416_v38 }
 0x195   : > { %755 = vst.msk [vmem:[%s237_s29 + $0x2] sm:$0x3] %vm475_vm8, %v474_v47  ;;  %761 = vmatmul.msk.f32.vlgmr.msrb.gmra.mxu2 %vm488_vm9, %v474_v47  ;;  %763 = vmatmul.msk.f32.vlgmr.msrb.gmra.mxu3 %vm488_vm9, %v474_v47 }
 0x20a   : > { %v514_v53 = vpop.f32.mrf.mxu0  ;;  %v534_v54 = vpop.f32.mrf.mxu1 }
 0x218   : > { %v566_v48 = vpop.f32.mrf.mxu2  ;;  %v586_v49 = vpop.f32.mrf.mxu3 }
 0x219   : > { %v591_v50 = vrot.slane %v566_v48, 6  ;;  %v592_v51 = vrot.slane %v586_v49, 6 }
 0x21b   : > { %v595_v55 = vsel %vm492_vm5, %v514_v53, %v591_v50  ;;  %v596_v57 = vsel %vm492_vm5, %v534_v54, %v592_v51 }
 0x21c   : > { %v603_v58 = vsel %vm923_vm2, %v599_v52, %v596_v57  ;;  %v602_v60 = vsel %vm919_vm1, %v598_v56, %v595_v55 }
 0x21d   : > { %v606_v59 = vrot.slane %v603_v58, 4 }
 0x21f   : > { %v607_v61 = vsel %vm480_vm4, %v602_v60, %v606_v59 }
 0x220   : > { %609 = vst [vmem:[%s232_s6] sm:$0xff] %v607_v61 }
 0x221 PF: > { %s17_s15 = sadd.s32 1, %s850_s15  }
 0x222   : > { %p14_p7 = scmp.ge.s32.totalorder %s17_s15, 4  }
 0x224   :  { %16 = sbr.rel (!%p14_p7) target bundleno = 2 (0x2), region = 84 }
 0x229   :  { %647 = vsyncpa [#allocation3], 1 }
 0x22a   :  { %649 = vsyncpa [#allocation3 + $0x1], 1 }
 0x22b   :  { %650 = vsyncpa [#allocation5], 1 }

</bundles_post_ra>
